<compile_context>
chip_gen: v7x
topology: tpu7x:2x2x1
jax: 0.10.0
libtpu: 0.0.40
codegen_flags: <defaults>
</compile_context>

<pallas_src>
import math

import jax
import jax.numpy as jnp
from jax import lax
from jax.experimental import pallas as pl
from jax.experimental.pallas import tpu as pltpu

HIDDEN = 256


def _round_up(x, m):
    return ((x + m - 1) // m) * m


def value_net_kernel(x_ref, w1_ref, w2_ref, pk_ref, b3_ref, o_ref):
    # x_ref:  (tm, inp) f32        -- cast to compute dtype in-kernel (saves an
    #                                  extra HBM pass over x in the wrapper)
    # w1_ref: (inp, H) compute dt  -- VMEM-resident across grid steps
    # w2_ref: (H, H)   compute dt  -- VMEM-resident across grid steps
    # pk_ref: (8, H)   f32         -- row 0 = b1, row 1 = b2, row 2 = fc3 weight
    # b3_ref: (1, 1)   f32 in SMEM -- fc3 bias scalar
    # o_ref:  (1, tm)  f32         -- lane-dense output row for this batch tile
    cdt = w1_ref.dtype
    pk = pk_ref[...]                                                   # (8, H) f32

    x = x_ref[...].astype(cdt)                                         # in-kernel cast
    h1 = jnp.dot(x, w1_ref[...], preferred_element_type=jnp.float32)   # MXU, f32 acc
    h1 = jnp.maximum(h1 + pk[0:1, :], 0.0)                             # f32 epilogue (VPU)

    h2 = jnp.dot(h1.astype(cdt), w2_ref[...],
                 preferred_element_type=jnp.float32)                   # MXU, f32 acc
    h2 = jnp.maximum(h2 + pk[1:2, :], 0.0)                             # f32 epilogue (VPU)

    # fc3 (out_features == 1) as an "NT" dot: (8, H) x (tm, H)^T -> (8, tm),
    # f32 accumulation.  Row 2 is the fc3 output and it is already lane-dense,
    # so the store below is full-width (no (tm,1) column / masked 1-lane vst).
    y8 = lax.dot_general(pk.astype(cdt), h2.astype(cdt),
                         (((1,), (1,)), ((), ())),
                         preferred_element_type=jnp.float32)           # (8, tm)
    o_ref[...] = (y8[2:3, :] + b3_ref[0, 0]).astype(o_ref.dtype)       # (1, tm)


def value_network_forward(x, params, *, compute_dtype=jnp.bfloat16, tile_m=1024,
                          vmem_budget_bytes=32 * 1024 * 1024):
    """x: (B, inp) float. Returns (B,) float32.

    compute_dtype controls the matmul operand dtype (bf16 default: native MXU
    path, half the weight VMEM residency); accumulation and the bias/ReLU
    epilogues always run in f32.
    """
    w1, b1, w2, b2, w3, b3 = params
    B, inp = x.shape
    H = w1.shape[1]

    # x streamed as f32 (cast to compute dtype happens in-kernel); weights are
    # tiny, casting them in the wrapper is negligible.
    x = x.astype(jnp.float32)
    w1c = w1.astype(compute_dtype)
    w2c = w2.astype(compute_dtype)

    # Pack the small f32 operands into a single (8, H) block:
    #   row 0 = b1, row 1 = b2, row 2 = fc3 weight row, rows 3..7 = 0.
    pk = jnp.zeros((8, H), jnp.float32)
    pk = pk.at[0, :].set(jnp.reshape(b1, (H,)).astype(jnp.float32))
    pk = pk.at[1, :].set(jnp.reshape(b2, (H,)).astype(jnp.float32))
    pk = pk.at[2, :].set(jnp.reshape(w3, (H,)).astype(jnp.float32))
    b3s = jnp.reshape(b3, (1, 1)).astype(jnp.float32)                  # SMEM scalar

    # --- Batch tile selection --------------------------------------------------
    sub, lane = 8, 128
    csize = jnp.dtype(compute_dtype).itemsize
    inp_pad = _round_up(inp, lane)
    # Bytes that scale with tm: x double-buffer (f32, lane-padded) + in-kernel
    # x cast + h1/h2 f32 temporaries + their compute-dtype casts + y8/out rows.
    per_row = (2 * inp_pad * 4) + (inp_pad * csize) + (2 * H * 4) + (2 * H * csize) + (4 * 8 * 4)
    # Index-invariant residents (double-buffered by the pipeline) + slack.
    fixed = 2 * (_round_up(inp, 16) * H + H * H) * csize + 2 * 8 * H * 4 + (256 << 10)
    tm_cap = max(sub, (vmem_budget_bytes - fixed) // per_row)

    tm = min(tile_m, tm_cap, _round_up(B, sub))
    if B > sub:
        # Guarantee >= 2 grid steps so the "parallel" batch axis actually splits
        # across both v7x TensorCores (no-op for v5e/v6e: 1 TC/chip).
        tm = min(tm, _round_up(pl.cdiv(B, 2), sub))
    tm = max(sub, (tm // sub) * sub)

    n_tiles = pl.cdiv(B, tm)
    grid = (n_tiles,)

    cost = pl.CostEstimate(
        flops=2 * B * (inp * H + H * H + H),
        transcendentals=0,
        bytes_accessed=(x.size * 4
                        + w1c.size * csize + w2c.size * csize
                        + pk.size * 4 + 4
                        + n_tiles * tm * 4),
    )

    out = pl.pallas_call(
        value_net_kernel,
        out_shape=jax.ShapeDtypeStruct((n_tiles, tm), jnp.float32),
        grid=grid,
        in_specs=[
            pl.BlockSpec((tm, inp), lambda i: (i, 0)),     # x: tiled over batch (f32)
            pl.BlockSpec((inp, H), lambda i: (0, 0)),      # W1: VMEM-resident
            pl.BlockSpec((H, H), lambda i: (0, 0)),        # W2: VMEM-resident
            pl.BlockSpec((8, H), lambda i: (0, 0)),        # packed b1/b2/w3 (f32)
            pl.BlockSpec(memory_space=pltpu.MemorySpace.SMEM),  # b3 scalar
        ],
        out_specs=pl.BlockSpec((1, tm), lambda i: (i, 0)),  # lane-dense output row
        compiler_params=pltpu.CompilerParams(
            dimension_semantics=("parallel",),              # megacore batch split
            vmem_limit_bytes=48 * 1024 * 1024,              # safe for v7x (64 MiB)
        ),
        cost_estimate=cost,
    )(x, w1c, w2c, pk, b3s)

    # Row order: grid-step-major then within-tile -> flat reshape is batch order.
    # torch.squeeze(x, 1); drop any ragged-tile rows >= B.
    return out.reshape(-1)[:B]


def init_params(key, inp):
    """Mirror nn.Linear default init (U(-1/sqrt(fan_in), +)) with fc3 zeroed,
    exactly as the PyTorch module's __init__ does."""
    k1, k2, k3, k4 = jax.random.split(key, 4)
    bound1 = 1.0 / math.sqrt(inp)
    w1 = jax.random.uniform(k1, (inp, HIDDEN), jnp.float32, -bound1, bound1)
    b1 = jax.random.uniform(k2, (1, HIDDEN), jnp.float32, -bound1, bound1)
    bound2 = 1.0 / math.sqrt(HIDDEN)
    w2 = jax.random.uniform(k3, (HIDDEN, HIDDEN), jnp.float32, -bound2, bound2)
    b2 = jax.random.uniform(k4, (1, HIDDEN), jnp.float32, -bound2, bound2)
    # fc3 weight and bias are explicitly zeroed in the reference module.
    w3 = jnp.zeros((HIDDEN, 1), jnp.float32)
    b3 = jnp.zeros((1, 1), jnp.float32)
    return (w1, b1, w2, b2, w3, b3)


def _ref_forward(x, p):
    w1, b1, w2, b2, w3, b3 = p
    h1 = jnp.maximum(x @ w1 + b1.reshape(1, -1), 0.0)
    h2 = jnp.maximum(h1 @ w2 + b2.reshape(1, -1), 0.0)
    return jnp.squeeze(h2 @ w3 + b3.reshape(1, 1), axis=1)


if __name__ == "__main__":
    key = jax.random.PRNGKey(0)
    k_in, k_p, k_w3, k_b3 = jax.random.split(key, 4)

    B, INP = 8, 32
    x = jax.random.normal(k_in, (B, INP), jnp.float32)
    params = init_params(k_p, INP)

    # 1) Module-faithful params (fc3 zeroed): output must be exactly zero.
    out = value_network_forward(x, params)
    jax.block_until_ready(out)
    assert out.shape == (B,), out.shape
    assert jnp.allclose(out, jnp.zeros((B,), jnp.float32), atol=1e-6), out

    # 2) Validate the full pipeline math with a non-zero fc3 (forward() accepts
    #    arbitrary params; this exercises the kernel end to end) in f32.
    w1, b1, w2, b2, _, _ = params
    bound3 = 1.0 / math.sqrt(HIDDEN)
    w3 = jax.random.uniform(k_w3, (HIDDEN, 1), jnp.float32, -bound3, bound3)
    b3 = jax.random.uniform(k_b3, (1, 1), jnp.float32, -bound3, bound3)
    params_nz = (w1, b1, w2, b2, w3, b3)
    ref = _ref_forward(x, params_nz)

    out_f32 = value_network_forward(x, params_nz, compute_dtype=jnp.float32)
    jax.block_until_ready(out_f32)
    assert out_f32.shape == (B,), out_f32.shape
    assert jnp.allclose(out_f32, ref, atol=1e-5, rtol=1e-5), (out_f32, ref)

    # 3) bf16 fast path (default; f32 accumulation): looser tolerance.
    out_bf16 = value_network_forward(x, params_nz, compute_dtype=jnp.bfloat16)
    jax.block_until_ready(out_bf16)
    assert out_bf16.shape == (B,), out_bf16.shape
    assert jnp.allclose(out_bf16, ref, atol=5e-2, rtol=5e-2), (out_bf16, ref)

    print("KERNEL_OK")
</pallas_src>

<mosaic_0001>
module attributes {stable_mosaic.version = 11 : i64} {
  func.func @value_net_kernel(%arg0: i32, %arg1: memref<8x32xf32, #tpu.memory_space<vmem>>, %arg2: memref<32x256xbf16, #tpu.memory_space<vmem>>, %arg3: memref<256x256xbf16, #tpu.memory_space<vmem>>, %arg4: memref<8x256xf32, #tpu.memory_space<vmem>>, %arg5: memref<1x1xf32, #tpu.memory_space<smem>>, %arg6: memref<1x8xf32, #tpu.memory_space<vmem>>) attributes {dimension_semantics = [#tpu.dimension_semantics<parallel>], iteration_bounds = array<i64: 1>, scalar_prefetch = 0 : i64, scratch_operands = 0 : i64, tpu.core_type = #tpu.core_type<tc>, window_params = [{transform_indices = @transform_0, window_bounds = array<i64: 8, 32>}, {pipeline_mode = #tpu.pipeline_mode<synchronous>, transform_indices = @transform_1, window_bounds = array<i64: 32, 256>}, {pipeline_mode = #tpu.pipeline_mode<synchronous>, transform_indices = @transform_2, window_bounds = array<i64: 256, 256>}, {pipeline_mode = #tpu.pipeline_mode<synchronous>, transform_indices = @transform_3, window_bounds = array<i64: 8, 256>}, {transform_indices = @transform_4, window_bounds = array<i64: 1, 1>}, {transform_indices = @transform_5, window_bounds = array<i64: 1, 8>}]} {
    %c0 = arith.constant 0 : index
    %c0_0 = arith.constant 0 : index
    %0 = vector.load %arg4[%c0, %c0_0] : memref<8x256xf32, #tpu.memory_space<vmem>>, vector<8x256xf32>
    %c0_1 = arith.constant 0 : index
    %c0_2 = arith.constant 0 : index
    %1 = vector.load %arg1[%c0_1, %c0_2] : memref<8x32xf32, #tpu.memory_space<vmem>>, vector<8x32xf32>
    %2 = arith.truncf %1 : vector<8x32xf32> to vector<8x32xbf16>
    %c0_3 = arith.constant 0 : index
    %c0_4 = arith.constant 0 : index
    %3 = vector.load %arg2[%c0_3, %c0_4] : memref<32x256xbf16, #tpu.memory_space<vmem>>, vector<32x256xbf16>
    %cst = arith.constant dense<0.000000e+00> : vector<8x256xf32>
    %4 = tpu.matmul %2, %3, %cst {dimension_numbers = #tpu.dot_dimension_numbers<[1], [0], [0], [1], [0, 0, 1, 1], [], []>} : vector<8x32xbf16>, vector<32x256xbf16>, vector<8x256xf32> -> vector<8x256xf32>
    %5 = vector.extract_strided_slice %0 {offsets = [0, 0], sizes = [1, 256], strides = [1, 1]} : vector<8x256xf32> to vector<1x256xf32>
    %6 = vector.broadcast %5 : vector<1x256xf32> to vector<8x256xf32>
    %7 = arith.addf %4, %6 : vector<8x256xf32>
    %cst_5 = arith.constant 0.000000e+00 : f32
    %8 = vector.broadcast %cst_5 : f32 to vector<8x256xf32>
    %9 = arith.maximumf %7, %8 : vector<8x256xf32>
    %10 = arith.truncf %9 : vector<8x256xf32> to vector<8x256xbf16>
    %c0_6 = arith.constant 0 : index
    %c0_7 = arith.constant 0 : index
    %11 = vector.load %arg3[%c0_6, %c0_7] : memref<256x256xbf16, #tpu.memory_space<vmem>>, vector<256x256xbf16>
    %cst_8 = arith.constant dense<0.000000e+00> : vector<8x256xf32>
    %12 = tpu.matmul %10, %11, %cst_8 {dimension_numbers = #tpu.dot_dimension_numbers<[1], [0], [0], [1], [0, 0, 1, 1], [], []>} : vector<8x256xbf16>, vector<256x256xbf16>, vector<8x256xf32> -> vector<8x256xf32>
    %13 = vector.extract_strided_slice %0 {offsets = [1, 0], sizes = [1, 256], strides = [1, 1]} : vector<8x256xf32> to vector<1x256xf32>
    %14 = vector.broadcast %13 : vector<1x256xf32> to vector<8x256xf32>
    %15 = arith.addf %12, %14 : vector<8x256xf32>
    %cst_9 = arith.constant 0.000000e+00 : f32
    %16 = vector.broadcast %cst_9 : f32 to vector<8x256xf32>
    %17 = arith.maximumf %15, %16 : vector<8x256xf32>
    %18 = arith.truncf %0 : vector<8x256xf32> to vector<8x256xbf16>
    %19 = arith.truncf %17 : vector<8x256xf32> to vector<8x256xbf16>
    %cst_10 = arith.constant dense<0.000000e+00> : vector<8x8xf32>
    %20 = tpu.matmul %18, %19, %cst_10 {dimension_numbers = #tpu.dot_dimension_numbers<[1], [1], [0], [0], [0, 0, 1, 0], [], []>} : vector<8x256xbf16>, vector<8x256xbf16>, vector<8x8xf32> -> vector<8x8xf32>
    %21 = vector.extract_strided_slice %20 {offsets = [2, 0], sizes = [1, 8], strides = [1, 1]} : vector<8x8xf32> to vector<1x8xf32>
    %c0_11 = arith.constant 0 : index
    %c0_12 = arith.constant 0 : index
    %22 = memref.load %arg5[%c0_11, %c0_12] : memref<1x1xf32, #tpu.memory_space<smem>>
    %23 = vector.broadcast %22 : f32 to vector<1x8xf32>
    %24 = arith.addf %21, %23 : vector<1x8xf32>
    %c0_13 = arith.constant 0 : index
    %c0_14 = arith.constant 0 : index
    %25 = vector.load %arg6[%c0_13, %c0_14] : memref<1x8xf32, #tpu.memory_space<vmem>>, vector<1x8xf32>
    tpu.vector_store %arg6[%c0_13, %c0_14], %24 {strides = array<i32>} : memref<1x8xf32, #tpu.memory_space<vmem>>, vector<1x8xf32>,
    return
  }
  func.func @transform_0(%arg0: i32) -> (i32, i32) {
    %c0_i32 = arith.constant 0 : i32
    %c0_i32_0 = arith.constant 0 : i32
    return %arg0, %c0_i32 : i32, i32
  }
  func.func @transform_1(%arg0: i32) -> (i32, i32) {
    %c0_i32 = arith.constant 0 : i32
    %c0_i32_0 = arith.constant 0 : i32
    %c0_i32_1 = arith.constant 0 : i32
    return %c0_i32, %c0_i32_0 : i32, i32
  }
  func.func @transform_2(%arg0: i32) -> (i32, i32) {
    %c0_i32 = arith.constant 0 : i32
    %c0_i32_0 = arith.constant 0 : i32
    %c0_i32_1 = arith.constant 0 : i32
    return %c0_i32, %c0_i32_0 : i32, i32
  }
  func.func @transform_3(%arg0: i32) -> (i32, i32) {
    %c0_i32 = arith.constant 0 : i32
    %c0_i32_0 = arith.constant 0 : i32
    %c0_i32_1 = arith.constant 0 : i32
    return %c0_i32, %c0_i32_0 : i32, i32
  }
  func.func @transform_4(%arg0: i32) -> (i32, i32) {
    %c0_i32 = arith.constant 0 : i32
    %c0_i32_0 = arith.constant 0 : i32
    %c0_i32_1 = arith.constant 0 : i32
    return %c0_i32, %c0_i32_0 : i32, i32
  }
  func.func @transform_5(%arg0: i32) -> (i32, i32) {
    %c0_i32 = arith.constant 0 : i32
    %c0_i32_0 = arith.constant 0 : i32
    return %arg0, %c0_i32 : i32, i32
  }
}

</mosaic_0001>

<bundles_post_ra>
// kernel: tpu_custom_call.1
= control target key start
LH: loop header
LB: loop body
LE: loop exit
PB: predicated region body
PF: predicated region fallthrough
CT: control target
= control target key end

     0   :  { %11 = vsyncpa [#allocation4], 0  ;;  %s792_s0 = inlined_call_operand.hbm [shape: f32[8,32], index: 0, kind: input, shape index: {}]   ;;  %s793_s1 = inlined_call_operand.hbm [shape: bf16[32,256], index: 1, kind: input, shape index: {}]   ;;  %s794_s2 = inlined_call_operand.hbm [shape: bf16[256,256], index: 2, kind: input, shape index: {}]   ;;  %s795_s3 = inlined_call_operand.hbm [shape: f32[8,256], index: 3, kind: input, shape index: {}]   ;;  %s796_s4 = inlined_call_operand.<no memory space> [shape: f32[1,1], index: 4, kind: input, shape index: {}]   ;;  %s797_s5 = inlined_call_operand.hbm [shape: f32[1,8], index: 5, kind: output, shape index: {}]  }
   0x1   :  { %12 = vsyncpa [#allocation7], 0 }
   0x2   :  { %13 = vsyncpa [#allocation10], 0 }
   0x3   :  { %14 = vsyncpa [#allocation5], 0  ;;  %s685_s18 = smov [#allocation6]   ;;  %s567_s22 = scalar_lea.hbm %s793_s1, 512 }
   0x4   :  { %s30_s19 = sshll.u32 %s685_s18, 4  ;;  %p568_p0 = scmp.ne.s32.totalorder %s793_s1, %s567_s22  ;;  %s31_s19 = int_to_ptr.vmem [resolvable:$true] %s30_s19 }
   0x5   :  { %p571_p1 = scmp.lt.u32.totalorder %s567_s22, %s793_s1 }
   0x7   :  { %p573_p2 = pnand %p571_p1, %p568_p0 }
   0x9   :  { %576 = shalt.err (!%p573_p2)
}
   0xa   :  { %s577_s27 = scalar_lea.vmem %s31_s19, 512  ;;  %p582_p4 = scmp.lt.s32.totalorder %s31_s19, %s31_s19 }
   0xb   :  { %p578_p3 = scmp.ne.s32.totalorder %s31_s19, %s577_s27  ;;  %p583_p5 = scmp.lt.s32.totalorder %s577_s27, %s577_s27 }
   0xd   :  { %p584_p6 = por %p583_p5, %p582_p4 }
   0xf   :  { %p585_p7 = pnand %p584_p6, %p578_p3 }
  0x11   :  { %588 = shalt.err (!%p585_p7)
}
  0x12   :  { %s686_s28 = smov 128   ;;  %s687_s29 = smov 8  }
  0x13   :  { %36 = dma.hbm_to_vmem [thread:$0]  %s793_s1, 512, %s31_s19, [#allocation7], %s686_s28, %s686_s28, %s687_s29  }
  0x14   :  { %s688_s7 = smov [#allocation3]   ;;  %s689_s9 = smov [#allocation8]  }
  0x15   :  { %s21_s8 = sshll.u32 %s688_s7, 4  ;;  %s42_s10 = sshll.u32 %s689_s9, 4  ;;  %s22_s8 = int_to_ptr.vmem [resolvable:$true] %s21_s8  ;;  %s43_s10 = int_to_ptr.vmem [resolvable:$true] %s42_s10 }
  0x16   :  { %s589_s13 = scalar_lea.hbm %s792_s0, 128 }
  0x17   :  { %p590_p8 = scmp.ne.s32.totalorder %s792_s0, %s589_s13  ;;  %p593_p9 = scmp.lt.u32.totalorder %s589_s13, %s792_s0 }
  0x19   :  { %p595_p10 = pnand %p593_p9, %p590_p8 }
  0x1b   :  { %598 = shalt.err (!%p595_p10)
}
  0x1c   :  { %s599_s1 = scalar_lea.vmem %s22_s8, 128  ;;  %p604_p12 = scmp.lt.s32.totalorder %s22_s8, %s22_s8 }
  0x1d   :  { %p600_p11 = scmp.ne.s32.totalorder %s22_s8, %s599_s1  ;;  %p605_p13 = scmp.lt.s32.totalorder %s599_s1, %s599_s1 }
  0x1f   :  { %p606_p0 = por %p605_p13, %p604_p12 }
  0x21   :  { %p607_p1 = pnand %p606_p0, %p600_p11 }
  0x23   :  { %610 = shalt.err (!%p607_p1)
}
  0x24   :  { %24 = dma.hbm_to_vmem [thread:$0]  %s792_s0, 128, %s22_s8, [#allocation4]  }
  0x25   :  { %s611_s22 = scalar_lea.hbm %s794_s2, 4096 }
  0x26   :  { %p612_p2 = scmp.ne.s32.totalorder %s794_s2, %s611_s22  ;;  %p615_p3 = scmp.lt.u32.totalorder %s611_s22, %s794_s2 }
  0x28   :  { %p617_p4 = pnand %p615_p3, %p612_p2 }
  0x2a   :  { %620 = shalt.err (!%p617_p4)
}
  0x2b   :  { %s621_s27 = scalar_lea.vmem %s43_s10, 4096  ;;  %p626_p6 = scmp.lt.s32.totalorder %s43_s10, %s43_s10 }
  0x2c   :  { %p622_p5 = scmp.ne.s32.totalorder %s43_s10, %s621_s27  ;;  %p627_p7 = scmp.lt.s32.totalorder %s621_s27, %s621_s27 }
  0x2e   :  { %p628_p8 = por %p627_p7, %p626_p6 }
  0x30   :  { %p629_p9 = pnand %p628_p8, %p622_p5 }
  0x32   :  { %632 = shalt.err (!%p629_p9)
}
  0x33   :  { %48 = dma.hbm_to_vmem [thread:$0]  %s794_s2, 4096, %s43_s10, [#allocation7], %s686_s28, %s686_s28, %s687_s29  }
  0x34   :  { %s690_s6 = smov [#allocation9]   ;;  %s633_s11 = scalar_lea.hbm %s795_s3, 256 }
  0x35   :  { %s55_s7 = sshll.u32 %s690_s6, 4  ;;  %p634_p10 = scmp.ne.s32.totalorder %s795_s3, %s633_s11  ;;  %s56_s7 = int_to_ptr.vmem [resolvable:$true] %s55_s7 }
  0x36   :  { %p637_p11 = scmp.lt.u32.totalorder %s633_s11, %s795_s3 }
  0x38   :  { %p639_p12 = pnand %p637_p11, %p634_p10 }
  0x3a   :  { %642 = shalt.err (!%p639_p12)
}
  0x3b   :  { %s643_s16 = scalar_lea.vmem %s56_s7, 256  ;;  %p648_p0 = scmp.lt.s32.totalorder %s56_s7, %s56_s7 }
  0x3c   :  { %p644_p13 = scmp.ne.s32.totalorder %s56_s7, %s643_s16  ;;  %p649_p1 = scmp.lt.s32.totalorder %s643_s16, %s643_s16 }
  0x3e   :  { %p650_p2 = por %p649_p1, %p648_p0 }
  0x40   :  { %p651_p3 = pnand %p650_p2, %p644_p13 }
  0x42   :  { %654 = shalt.err (!%p651_p3)
}
  0x43   :  { %58 = dma.hbm_to_vmem [thread:$0]  %s795_s3, 256, %s56_s7, [#allocation10]  }
  0x44   :  { %677 = dma.done.wait [#allocation4], 128  }
  0x45   :  { %678 = vsyncadd [#allocation4], 4294967168 }
  0x46   :  { %679 = dma.done.wait [#allocation7], 4608  }
  0x47   :  { %680 = vsyncadd [#allocation7], 4294962688 }
  0x48   :  { %681 = dma.done.wait [#allocation10], 256  }
  0x49   :  { %682 = vsyncadd [#allocation10], 4294967040  ;;  %v691_v0 = vmov 0   ;;  %v513_v1 = vld [vmem:[#allocation6 + $0x4] ss:$8 sps:$4 sm:$0xff]   ;;  %v76_v5 = vld [vmem:[#allocation3] sm:$0xff]  ;;  %v82_v39 = vlaneseq }
  0x4a   :  { %146 = vmatprep.mubr.bf16.mxu0 %v691_v0  ;;  %v515_v2 = vld [vmem:[#allocation6] ss:$8 sps:$4 sm:$0xff]   ;;  %114 = vmatprep.subr.bf16.mxu0 %v513_v1  ;;  %v516_v3 = vld [vmem:[#allocation6 + $0x14] ss:$8 sps:$4 sm:$0xff]   ;;  %v518_v4 = vld [vmem:[#allocation6 + $0x10] ss:$8 sps:$4 sm:$0xff]   ;;  %v77_v9 = vpack.c.bf16 %v76_v5, %v76_v5 }
  0x4b   :  { %115 = vmatpush1.bf16.msra.mxu0 %v515_v2  ;;  %v519_v6 = vld [vmem:[#allocation8 + $0x4] ss:$8 sps:$4 sm:$0xff]   ;;  %v521_v7 = vld [vmem:[#allocation8] ss:$8 sps:$4 sm:$0xff]   ;;  %v522_v8 = vld [vmem:[#allocation8 + $0x14] ss:$8 sps:$4 sm:$0xff]  }
  0x4c   :  { %116 = vmatprep.subr.bf16.mxu0 %v516_v3  ;;  %359 = vmatprep.subr.bf16.mxu1 %v519_v6  ;;  %v524_v10 = vld [vmem:[#allocation8 + $0x10] ss:$8 sps:$4 sm:$0xff]   ;;  %vm110_vm0 = vcmask 261120   ;;  %v525_v11 = vld [vmem:[#allocation8 + $0x24] ss:$8 sps:$4 sm:$0xff]   ;;  %v83_v40 = vshrl.u32 %v82_v39, 7 }
  0x4d   :  { %360 = vmatpush1.bf16.msra.mxu1 %v521_v7  ;;  %v527_v12 = vld [vmem:[#allocation8 + $0x20] ss:$8 sps:$4 sm:$0xff]   ;;  %v528_v13 = vld [vmem:[#allocation8 + $0x34] ss:$8 sps:$4 sm:$0xff]   ;;  %v530_v14 = vld [vmem:[#allocation8 + $0x30] ss:$8 sps:$4 sm:$0xff]   ;;  %v447_v7 = vstv %s796_s4 }
  0x4e   :  { %361 = vmatprep.subr.bf16.mxu1 %v522_v8  ;;  %v531_v15 = vld [vmem:[#allocation8 + $0x44] ss:$8 sps:$4 sm:$0xff]   ;;  %v533_v16 = vld [vmem:[#allocation8 + $0x40] ss:$8 sps:$4 sm:$0xff]   ;;  %v534_v17 = vld [vmem:[#allocation8 + $0x54] ss:$8 sps:$4 sm:$0xff]  }
  0x4f   :  { %117 = vmatpush1.bf16.msra.mxu0 %v518_v4  ;;  %v536_v18 = vld [vmem:[#allocation8 + $0x50] ss:$8 sps:$4 sm:$0xff]   ;;  %v537_v19 = vld [vmem:[#allocation8 + $0x64] ss:$8 sps:$4 sm:$0xff]   ;;  %v539_v20 = vld [vmem:[#allocation8 + $0x60] ss:$8 sps:$4 sm:$0xff]  }
  0x50   :  { %v540_v21 = vld [vmem:[#allocation8 + $0x74] ss:$8 sps:$4 sm:$0xff]   ;;  %v542_v22 = vld [vmem:[#allocation8 + $0x70] ss:$8 sps:$4 sm:$0xff]   ;;  %v543_v23 = vld [vmem:[#allocation8 + $0x84] ss:$8 sps:$4 sm:$0xff]  }
  0x51   :  { %362 = vmatpush1.bf16.msra.mxu1 %v524_v10  ;;  %v545_v24 = vld [vmem:[#allocation8 + $0x80] ss:$8 sps:$4 sm:$0xff]   ;;  %v546_v25 = vld [vmem:[#allocation8 + $0x94] ss:$8 sps:$4 sm:$0xff]   ;;  %v548_v26 = vld [vmem:[#allocation8 + $0x90] ss:$8 sps:$4 sm:$0xff]  }
  0x52   :  { %472 = vmatmul.mubr.msk.bf16.vlgmr.msra.gmra.mrb[0].mxu0 %vm110_vm0, %v77_v9  ;;  %363 = vmatprep.subr.bf16.mxu1 %v525_v11  ;;  %v549_v27 = vld [vmem:[#allocation8 + $0xa4] ss:$8 sps:$4 sm:$0xff]   ;;  %v551_v28 = vld [vmem:[#allocation8 + $0xa0] ss:$8 sps:$4 sm:$0xff]   ;;  %v552_v29 = vld [vmem:[#allocation8 + $0xb4] ss:$8 sps:$4 sm:$0xff]  }
  0x53   :  { %v554_v30 = vld [vmem:[#allocation8 + $0xb0] ss:$8 sps:$4 sm:$0xff]   ;;  %v555_v31 = vld [vmem:[#allocation8 + $0xc4] ss:$8 sps:$4 sm:$0xff]   ;;  %v557_v32 = vld [vmem:[#allocation8 + $0xc0] ss:$8 sps:$4 sm:$0xff]  }
  0x54   :  { %v558_v33 = vld [vmem:[#allocation8 + $0xd4] ss:$8 sps:$4 sm:$0xff]   ;;  %v560_v34 = vld [vmem:[#allocation8 + $0xd0] ss:$8 sps:$4 sm:$0xff]   ;;  %v561_v35 = vld [vmem:[#allocation8 + $0xe4] ss:$8 sps:$4 sm:$0xff]  }
  0x55   :  { %364 = vmatpush1.bf16.msra.mxu1 %v527_v12  ;;  %v563_v36 = vld [vmem:[#allocation8 + $0xe0] ss:$8 sps:$4 sm:$0xff]   ;;  %v564_v37 = vld [vmem:[#allocation8 + $0xf4] ss:$8 sps:$4 sm:$0xff]   ;;  %v566_v38 = vld [vmem:[#allocation8 + $0xf0] ss:$8 sps:$4 sm:$0xff]  }
  0x56   :  { %365 = vmatprep.subr.bf16.mxu1 %v528_v13  ;;  %v84_v41 = vsub.s32 0, %v83_v40  ;;  %v74_v42 = vld [vmem:[#allocation9] sm:$0xff]  ;;  %v75_v43 = vld [vmem:[#allocation9 + $0x8] sm:$0xff]  ;;  %v193_v57 = vsub.s32 1, %v83_v40  ;;  %s692_s10 = smov [#allocation11]   ;;  %vm449_vm1 = vcmask 59394  }
  0x57   :  { %v403_v56 = vpack.c.bf16 %v75_v43, %v75_v43  ;;  %v402_v6 = vpack.c.bf16 %v74_v42, %v74_v42  ;;  %s457_s17 = sshll.u32 %s692_s10, 4  ;;  %s458_s17 = int_to_ptr.vmem [resolvable:$true] %s457_s17 }
  0x58   :  { %v85_v44 = vrot.slane %v74_v42, %v84_v41  ;;  %v89_v45 = vrot.slane %v75_v43, %v84_v41  ;;  %v194_v58 = vrot.slane %v74_v42, %v193_v57  ;;  %v198_v59 = vrot.slane %v75_v43, %v193_v57  ;;  %s655_s1 = scalar_lea.vmem %s458_s17, 16  ;;  %s659_s18 = scalar_lea.vmem %s458_s17, 32 }
  0x59   :  { %366 = vmatpush1.bf16.msra.mxu1 %v530_v14  ;;  %438 = vmatprep.mubr.bf16.mxu0 %v403_v56  ;;  %p656_p4 = scmp.ne.s32.totalorder %s458_s17, %s655_s1  ;;  %p660_p5 = scmp.lt.s32.totalorder %s458_s17, %s458_s17 }
  0x5a   :  { %367 = vmatprep.subr.bf16.mxu1 %v531_v15  ;;  %p661_p6 = scmp.lt.s32.totalorder %s659_s18, %s655_s1 }
  0x5c   :  { %p662_p7 = por %p661_p6, %p660_p5 }
  0x5d   :  { %368 = vmatpush1.bf16.msra.mxu1 %v533_v16 }
  0x5e   :  { %369 = vmatprep.subr.bf16.mxu1 %v534_v17  ;;  %p663_p8 = pnand %p662_p7, %p656_p4 }
  0x61   :  { %370 = vmatpush1.bf16.msra.mxu1 %v536_v18 }
  0x62   :  { %371 = vmatprep.subr.bf16.mxu1 %v537_v19 }
  0x65   :  { %372 = vmatpush1.bf16.msra.mxu1 %v539_v20 }
  0x66   :  { %373 = vmatprep.subr.bf16.mxu1 %v540_v21 }
  0x69   :  { %374 = vmatpush1.bf16.msra.mxu1 %v542_v22 }
  0x6a   :  { %375 = vmatprep.subr.bf16.mxu1 %v543_v23 }
  0x6d   :  { %376 = vmatpush1.bf16.msra.mxu1 %v545_v24 }
  0x6e   :  { %377 = vmatprep.subr.bf16.mxu1 %v546_v25 }
  0x71   :  { %378 = vmatpush1.bf16.msra.mxu1 %v548_v26 }
  0x72   :  { %379 = vmatprep.subr.bf16.mxu1 %v549_v27 }
  0x75   :  { %380 = vmatpush1.bf16.msra.mxu1 %v551_v28 }
  0x76   :  { %381 = vmatprep.subr.bf16.mxu1 %v552_v29 }
  0x79   :  { %382 = vmatpush1.bf16.msra.mxu1 %v554_v30 }
  0x7a   :  { %383 = vmatprep.subr.bf16.mxu1 %v555_v31 }
  0x7d   :  { %384 = vmatpush1.bf16.msra.mxu1 %v557_v32 }
  0x7e   :  { %385 = vmatprep.subr.bf16.mxu1 %v558_v33 }
  0x81   :  { %386 = vmatpush1.bf16.msra.mxu1 %v560_v34 }
  0x82   :  { %387 = vmatprep.subr.bf16.mxu1 %v561_v35 }
  0x85   :  { %388 = vmatpush1.bf16.msra.mxu1 %v563_v36 }
  0x86   :  { %389 = vmatprep.subr.bf16.mxu1 %v564_v37 }
  0x89   :  { %390 = vmatpush1.bf16.msra.mxu1 %v566_v38 }
 0x125   :  { %v148_v46 = vpop.f32.mrb[0].mxu0 }
 0x126   :  { %v149_v47 = vadd.f32 %v148_v46, %v85_v44  ;;  %v150_v48 = vpop.f32.mrb[1].mxu0 }
 0x127   :  { %v151_v49 = vadd.f32 %v150_v48, %v89_v45  ;;  %v152_v50 = vpop.f32.mrb[2].mxu0 }
 0x128   :  { %v155_v51 = vmax.f32 %v149_v47, 0.0  ;;  %v153_v52 = vpop.f32.mrb[3].mxu0 }
 0x129   :  { %v156_v53 = vmax.f32 %v151_v49, 0.0 }
 0x12a   :  { %v157_v55 = vpack.c.bf16 %v155_v51, %v155_v51 }
 0x12b   :  { %v158_v54 = vpack.c.bf16 %v156_v53, %v156_v53 }
 0x12d   :  { %391 = vmatprep.mubr.bf16.mxu1 %v158_v54 }
 0x12e   :  { %392 = vmatmul.mubr.bf16.vlgmr.msra.gmra.mrb[0].mxu1 %v157_v55 }
 0x201   :  { %v393_v60 = vpop.f32.mrb[0].mxu1 }
 0x202   :  { %v394_v61 = vadd.f32 %v393_v60, %v194_v58  ;;  %v395_v62 = vpop.f32.mrb[1].mxu1 }
 0x203   :  { %v396_v63 = vadd.f32 %v395_v62, %v198_v59  ;;  %v397_v0 = vpop.f32.mrb[2].mxu1 }
 0x204   :  { %v400_v1 = vmax.f32 %v394_v61, 0.0  ;;  %v398_v2 = vpop.f32.mrb[3].mxu1 }
 0x205   :  { %v401_v3 = vmax.f32 %v396_v63, 0.0 }
 0x206   :  { %v404_v5 = vpack.c.bf16 %v400_v1, %v400_v1 }
 0x207   :  { %v405_v4 = vpack.c.bf16 %v401_v3, %v401_v3 }
 0x209   :  { %406 = vmatprep.subr.bf16.mxu0 %v405_v4 }
 0x20a   :  { %407 = vmatpush1.bf16.xpose.msra.mxu0 %v404_v5 }
 0x211   :  { %439 = vmatmul.mubr.bf16.vlgmr.msra.gmra.mrb[4].mxu0 %v402_v6 }
 0x2e4   :  { %v440_v8 = vpop.f32.mrb[4].mxu0 }
 0x2e5   :  { %v448_v9 = vadd.f32 %v447_v7, %v440_v8  ;;  %v442_v10 = vpop.f32.mrb[5].mxu0 }
 0x2e6   :  { %v443_v11 = vpop.f32.mrb[6].mxu0 }
 0x2e7   :  { %v444_v12 = vpop.f32.mrb[7].mxu0  ;;  %450 = vst.msk [vmem:[#allocation11 - $0x2] sm:$0x4] %vm449_vm1, %v448_v9 }
 0x2e8   :  { %666 = shalt.err (!%p663_p8)
}
 0x2e9   :  { %s667_s20 = scalar_lea.hbm %s797_s5, 16 }
 0x2ea   :  { %p668_p9 = scmp.ne.s32.totalorder %s797_s5, %s667_s20  ;;  %p671_p10 = scmp.lt.u32.totalorder %s667_s20, %s797_s5 }
 0x2ec   :  { %p673_p11 = pnand %p671_p10, %p668_p9 }
 0x2ee   :  { %676 = shalt.err (!%p673_p11)
}
 0x2ef   :  { %460 = dma.vmem_to_hbm [thread:$0]  %s458_s17, 16, %s797_s5, [#allocation5]  }
 0x2f0   :  { %683 = dma.done.wait [#allocation5], 16  }
 0x2f1   :  { %684 = vsyncadd [#allocation5], 4294967280 }
 0x2f2   :  { %464 = vsyncpa [#allocation4], 1 }
 0x2f3   :  { %465 = vsyncpa [#allocation7], 1 }
 0x2f4   :  { %466 = vsyncpa [#allocation10], 1 }
 0x2f5   :  { %467 = vsyncpa [#allocation5], 1 }

</bundles_post_ra>
